<compile_context>
chip_gen: v6e
topology: v6e:2x2x1
jax: 0.10.0
libtpu: 0.0.40
codegen_flags: <defaults>
</compile_context>

<pallas_src>
import functools

import jax
import jax.numpy as jnp
from jax.experimental import pallas as pl
from jax.experimental.pallas import tpu as pltpu


NEG_LARGE = -1e30  # mask value for padded label columns (exp() underflows to 0)


def _round_up(x, m):
    return (x + m - 1) // m * m


def bow_kernel(x_ref, w_ref, b_ref, o_ref, acc_ref, *, num_labels):
    k = pl.program_id(1)

    @pl.when(k == 0)
    def _():
        acc_ref[...] = jnp.zeros_like(acc_ref)

    # bf16 x bf16 -> f32 accumulate on the MXU
    acc_ref[...] += jnp.dot(x_ref[...], w_ref[...],
                            preferred_element_type=jnp.float32)

    @pl.when(k == pl.num_programs(1) - 1)
    def _():
        logits = acc_ref[...] + b_ref[...]                       # (tm, L_pad) f32
        # Mask padded label columns so they do not affect max / sum.
        lane = jax.lax.broadcasted_iota(jnp.int32, logits.shape, 1)
        logits = jnp.where(lane < num_labels, logits, NEG_LARGE)
        m = jnp.max(logits, axis=-1, keepdims=True)
        shifted = logits - m
        ssum = jnp.sum(jnp.exp(shifted), axis=-1, keepdims=True)
        o_ref[...] = (shifted - jnp.log(ssum)).astype(o_ref.dtype)


def bow_forward(bow_vec, weight_t, bias, *, tm=None, tk=None):
    """bow_vec: (B, V) f32; weight_t: (V, L) f32; bias: (1, L) f32 -> (B, L) f32."""
    B, V = bow_vec.shape
    L = weight_t.shape[1]

    L_pad = _round_up(L, 128)                       # lane-dense label axis
    if tm is None:
        tm = min(128, _round_up(B, 8))              # batch (M) tile
    if tk is None:
        tk = min(512, _round_up(V, 128))            # vocab (K) tile
    B_pad = _round_up(B, tm)
    V_pad = _round_up(V, tk)

    # Host-side padding + bf16 cast (counts 0-3 and small uniform weights are
    # safely representable; accumulation stays f32).
    x = jnp.zeros((B_pad, V_pad), jnp.bfloat16).at[:B, :V].set(
        bow_vec.astype(jnp.bfloat16))
    w = jnp.zeros((V_pad, L_pad), jnp.bfloat16).at[:V, :L].set(
        weight_t.astype(jnp.bfloat16))
    b = jnp.zeros((1, L_pad), jnp.float32).at[:, :L].set(
        bias.astype(jnp.float32).reshape(1, L))

    grid = (B_pad // tm, V_pad // tk)
    kernel = functools.partial(bow_kernel, num_labels=L)

    cost = pl.CostEstimate(
        flops=2 * B_pad * V_pad * L_pad,
        transcendentals=B_pad * (L_pad + 1),
        bytes_accessed=(x.size * 2 + w.size * 2 + b.size * 4
                        + B_pad * L_pad * 4),
    )

    out = pl.pallas_call(
        kernel,
        out_shape=jax.ShapeDtypeStruct((B_pad, L_pad), jnp.float32),
        grid_spec=pltpu.PrefetchScalarGridSpec(
            num_scalar_prefetch=0,
            grid=grid,
            in_specs=[
                pl.BlockSpec((tm, tk), lambda i, k: (i, k)),        # x tile
                pl.BlockSpec((tk, L_pad), lambda i, k: (k, 0)),     # weight tile
                pl.BlockSpec((1, L_pad), lambda i, k: (0, 0)),      # bias (lane-dense)
            ],
            out_specs=pl.BlockSpec((tm, L_pad), lambda i, k: (i, 0)),
            scratch_shapes=[pltpu.VMEM((tm, L_pad), jnp.float32)],  # f32 accumulator
        ),
        compiler_params=pltpu.CompilerParams(
            dimension_semantics=("parallel", "arbitrary"),
            vmem_limit_bytes=32 * 1024 * 1024,
        ),
        cost_estimate=cost,
    )(x, w, b)

    return out[:B, :L]


def reference_forward(bow_vec, weight_t, bias):
    # Same bf16-matmul / f32-accumulate math as the kernel.
    logits = jnp.dot(bow_vec.astype(jnp.bfloat16),
                     weight_t.astype(jnp.bfloat16),
                     preferred_element_type=jnp.float32) + bias
    return jax.nn.log_softmax(logits, axis=1)


if __name__ == "__main__":
    key = jax.random.PRNGKey(0)
    batch = 16
    vocab_size = 256
    num_labels = 16

    k_x, k_w, k_b = jax.random.split(key, 3)
    bound = 1.0 / (vocab_size ** 0.5)
    # PyTorch nn.Linear weight is (num_labels, vocab_size); we store its transpose.
    weight_t = jax.random.uniform(k_w, (vocab_size, num_labels),
                                  minval=-bound, maxval=bound, dtype=jnp.float32)
    bias = jax.random.uniform(k_b, (1, num_labels),
                              minval=-bound, maxval=bound, dtype=jnp.float32)
    # Bag-of-words counts (non-negative small integers as floats)
    bow_vec = jax.random.randint(k_x, (batch, vocab_size), 0, 4).astype(jnp.float32)

    # tm=8, tk=128 -> grid (2, 2): exercises both the parallel batch axis and
    # the K-accumulation path at these toy shapes.
    out = bow_forward(bow_vec, weight_t, bias, tm=8, tk=128)
    out = jax.block_until_ready(out)

    ref = reference_forward(bow_vec, weight_t, bias)
    assert out.shape == (batch, num_labels)
    assert jnp.allclose(out, ref, atol=1e-4, rtol=1e-4), "mismatch vs reference"
    print("KERNEL_OK")
</pallas_src>

<mosaic_0001>
module attributes {stable_mosaic.version = 11 : i64} {
  func.func @bow_kernel(%arg0: i32, %arg1: i32, %arg2: memref<8x128xbf16, #tpu.memory_space<vmem>>, %arg3: memref<128x128xbf16, #tpu.memory_space<vmem>>, %arg4: memref<1x128xf32, #tpu.memory_space<vmem>>, %arg5: memref<8x128xf32, #tpu.memory_space<vmem>>, %arg6: memref<8x128xf32, #tpu.memory_space<vmem>>) attributes {dimension_semantics = [#tpu.dimension_semantics<parallel>, #tpu.dimension_semantics<arbitrary>], iteration_bounds = array<i64: 2, 2>, scalar_prefetch = 0 : i64, scratch_operands = 1 : i64, tpu.core_type = #tpu.core_type<tc>, window_params = [{transform_indices = @transform_0, window_bounds = array<i64: 8, 128>}, {transform_indices = @transform_1, window_bounds = array<i64: 128, 128>}, {pipeline_mode = #tpu.pipeline_mode<synchronous>, transform_indices = @transform_2, window_bounds = array<i64: 1, 128>}, {transform_indices = @transform_3, window_bounds = array<i64: 8, 128>}]} {
    %c0_i32 = arith.constant 0 : i32
    %0 = arith.cmpi eq, %arg1, %c0_i32 : i32
    %1 = arith.extui %0 : i1 to i32
    %c0_i32_0 = arith.constant 0 : i32
    %2 = arith.cmpi ne, %1, %c0_i32_0 : i32
    scf.if %2 {
      %cst_9 = arith.constant 0.000000e+00 : f32
      %12 = vector.broadcast %cst_9 : f32 to vector<8x128xf32>
      %c0_10 = arith.constant 0 : index
      %c0_11 = arith.constant 0 : index
      %13 = vector.load %arg6[%c0_10, %c0_11] : memref<8x128xf32, #tpu.memory_space<vmem>>, vector<8x128xf32>
      tpu.vector_store %arg6[%c0_10, %c0_11], %12 {strides = array<i32>} : memref<8x128xf32, #tpu.memory_space<vmem>>, vector<8x128xf32>,
    } else {
    }
    %c0 = arith.constant 0 : index
    %c0_1 = arith.constant 0 : index
    %3 = vector.load %arg6[%c0, %c0_1] : memref<8x128xf32, #tpu.memory_space<vmem>>, vector<8x128xf32>
    %c0_2 = arith.constant 0 : index
    %c0_3 = arith.constant 0 : index
    %4 = vector.load %arg2[%c0_2, %c0_3] : memref<8x128xbf16, #tpu.memory_space<vmem>>, vector<8x128xbf16>
    %c0_4 = arith.constant 0 : index
    %c0_5 = arith.constant 0 : index
    %5 = vector.load %arg3[%c0_4, %c0_5] : memref<128x128xbf16, #tpu.memory_space<vmem>>, vector<128x128xbf16>
    %cst = arith.constant dense<0.000000e+00> : vector<8x128xf32>
    %6 = tpu.matmul %4, %5, %cst {dimension_numbers = #tpu.dot_dimension_numbers<[1], [0], [0], [1], [0, 0, 1, 1], [], []>} : vector<8x128xbf16>, vector<128x128xbf16>, vector<8x128xf32> -> vector<8x128xf32>
    %7 = arith.addf %3, %6 : vector<8x128xf32>
    %c0_6 = arith.constant 0 : index
    %c0_7 = arith.constant 0 : index
    %8 = vector.load %arg6[%c0_6, %c0_7] : memref<8x128xf32, #tpu.memory_space<vmem>>, vector<8x128xf32>
    tpu.vector_store %arg6[%c0_6, %c0_7], %7 {strides = array<i32>} : memref<8x128xf32, #tpu.memory_space<vmem>>, vector<8x128xf32>,
    %c1_i32 = arith.constant 1 : i32
    %9 = arith.cmpi eq, %arg1, %c1_i32 : i32
    %10 = arith.extui %9 : i1 to i32
    %c0_i32_8 = arith.constant 0 : i32
    %11 = arith.cmpi ne, %10, %c0_i32_8 : i32
    scf.if %11 {
      %c0_9 = arith.constant 0 : index
      %c0_10 = arith.constant 0 : index
      %12 = vector.load %arg6[%c0_9, %c0_10] : memref<8x128xf32, #tpu.memory_space<vmem>>, vector<8x128xf32>
      %c0_11 = arith.constant 0 : index
      %c0_12 = arith.constant 0 : index
      %13 = vector.load %arg4[%c0_11, %c0_12] : memref<1x128xf32, #tpu.memory_space<vmem>>, vector<1x128xf32>
      %14 = vector.broadcast %13 : vector<1x128xf32> to vector<8x128xf32>
      %15 = arith.addf %12, %14 : vector<8x128xf32>
      %16 = tpu.iota {dimensions = array<i32: 1>} : vector<8x128xi32>
      %c16_i32 = arith.constant 16 : i32
      %17 = vector.broadcast %c16_i32 : i32 to vector<8x128xi32>
      %18 = arith.cmpi slt, %16, %17 : vector<8x128xi32>
      %cst_13 = arith.constant -1.000000e+30 : f32
      %19 = vector.broadcast %cst_13 : f32 to vector<8x128xf32>
      %20 = arith.select %18, %15, %19 : vector<8x128xi1>, vector<8x128xf32>
      %cst_14 = arith.constant dense<0xFF800000> : vector<8xf32>
      %21 = vector.multi_reduction <maximumf>, %20, %cst_14 [1] : vector<8x128xf32> to vector<8xf32>
      %22 = vector.shape_cast %21 : vector<8xf32> to vector<8x1xf32>
      %23 = vector.broadcast %22 : vector<8x1xf32> to vector<8x128xf32>
      %24 = arith.subf %20, %23 : vector<8x128xf32>
      %25 = math.exp %24 : vector<8x128xf32>
      %cst_15 = arith.constant dense<0.000000e+00> : vector<8xf32>
      %26 = vector.multi_reduction <add>, %25, %cst_15 [1] : vector<8x128xf32> to vector<8xf32>
      %27 = vector.shape_cast %26 : vector<8xf32> to vector<8x1xf32>
      %28 = math.log %27 : vector<8x1xf32>
      %29 = vector.broadcast %28 : vector<8x1xf32> to vector<8x128xf32>
      %30 = arith.subf %24, %29 : vector<8x128xf32>
      %c0_16 = arith.constant 0 : index
      %c0_17 = arith.constant 0 : index
      %31 = vector.load %arg5[%c0_16, %c0_17] : memref<8x128xf32, #tpu.memory_space<vmem>>, vector<8x128xf32>
      tpu.vector_store %arg5[%c0_16, %c0_17], %30 {strides = array<i32>} : memref<8x128xf32, #tpu.memory_space<vmem>>, vector<8x128xf32>,
    } else {
    }
    return
  }
  func.func @transform_0(%arg0: i32, %arg1: i32) -> (i32, i32) {
    %c0_i32 = arith.constant 0 : i32
    return %arg0, %arg1 : i32, i32
  }
  func.func @transform_1(%arg0: i32, %arg1: i32) -> (i32, i32) {
    %c0_i32 = arith.constant 0 : i32
    %c0_i32_0 = arith.constant 0 : i32
    return %arg1, %c0_i32 : i32, i32
  }
  func.func @transform_2(%arg0: i32, %arg1: i32) -> (i32, i32) {
    %c0_i32 = arith.constant 0 : i32
    %c0_i32_0 = arith.constant 0 : i32
    %c0_i32_1 = arith.constant 0 : i32
    return %c0_i32, %c0_i32_0 : i32, i32
  }
  func.func @transform_3(%arg0: i32, %arg1: i32) -> (i32, i32) {
    %c0_i32 = arith.constant 0 : i32
    %c0_i32_0 = arith.constant 0 : i32
    return %arg0, %c0_i32 : i32, i32
  }
}

</mosaic_0001>

<bundles_post_ra>
// kernel: tpu_custom_call.1
= control target key start
LH: loop header
LB: loop body
LE: loop exit
PB: predicated region body
PF: predicated region fallthrough
CT: control target
= control target key end

     0   :  { %s1247_s0 = inlined_call_operand.hbm [shape: bf16[16,256], index: 0, kind: input, shape index: {}]   ;;  %s1248_s1 = inlined_call_operand.hbm [shape: bf16[256,128], index: 1, kind: input, shape index: {}]   ;;  %s1249_s2 = inlined_call_operand.vmem [shape: f32[1,128], index: 2, kind: input, shape index: {}]   ;;  %s1250_s3 = inlined_call_operand.hbm [shape: f32[16,128], index: 3, kind: output, shape index: {}]  }
   0x1   :  { %1259 = sst [smem:[#allocation20_spill]] %s1247_s0 }
   0x2   :  { %8 = vsyncpa [#allocation4], 0 }
   0x3   :  { %10 = vsyncpa [#allocation4 + $0x1], 0 }
   0x4   :  { %11 = vsyncpa [#allocation7], 0 }
   0x5   :  { %13 = vsyncpa [#allocation7 + $0x1], 0 }
   0x6   :  { %14 = vsyncpa [#allocation5], 0 }
   0x7   :  { %16 = vsyncpa [#allocation5 + $0x1], 0  ;;  %s946_s12 = smov 0   ;;  %s948_s13 = smov 0  }
   0x8   :  { %s950_s14 = smov 0   ;;  %s952_s15 = smov 0  }
   0x9   :  { %s954_s16 = smov 0   ;;  %s956_s17 = smov 0  }
   0xa   :  { %s958_s18 = smov 0   ;;  %s960_s19 = smov 0  }
   0xb   :  { %s962_s20 = smov 0   ;;  %s964_s21 = smov 0  }
   0xc   :  { %s966_s22 = smov 0   ;;  %s968_s23 = smov 0  }
   0xd   :  { %s970_s24 = smov 0   ;;  %s972_s25 = smov 0  }
   0xe LB: > { %1260 = sst [smem:[#allocation12_spill]] %s864_s12  ;;  %s1251_s26 = sadd.s32 4294967295, %s916_s25   ;;  %s916_s25 = sphi %s972_s25, %s22_s25   ;;  %s912_s24 = sphi %s970_s24, %s1304_s24   ;;  %s908_s23 = sphi %s968_s23, %s1303_s23   ;;  %s904_s22 = sphi %s966_s22, %s1302_s22   ;;  %s900_s21 = sphi %s964_s21, %s1301_s21   ;;  %s896_s20 = sphi %s962_s20, %s1290_s20   ;;  %s892_s19 = sphi %s960_s19, %s1300_s19   ;;  %s888_s18 = sphi %s958_s18, %s1299_s18   ;;  %s884_s17 = sphi %s956_s17, %s1298_s17   ;;  %s880_s16 = sphi %s954_s16, %s1297_s16   ;;  %s876_s15 = sphi %s952_s15, %s1296_s15   ;;  %s872_s14 = sphi %s950_s14, %s1287_s14   ;;  %s868_s13 = sphi %s948_s13, %s1295_s13   ;;  %s864_s12 = sphi %s946_s12, %s1294_s12  }
   0xf   : > { %1261 = sst [smem:[#allocation13_spill]] %s872_s14  ;;  %s31_s28 = sadd.s32 1, %s908_s23 }
  0x10   : > { %1262 = sst [smem:[#allocation14_spill]] %s896_s20  ;;  %s34_s29 = sadd.s32 1, %s912_s24 }
  0x11   : > { %p32_p0 = scmp.ge.s32.totalorder %s31_s28, 2  ;;  %s43_s30 = sadd.s32 1, %s896_s20 }
  0x12   : > { %p50_p1 = scmp.ne.s32.totalorder %s896_s20, %s892_s19  ;;  %p51_p2 = scmp.eq.s32.totalorder %s916_s25, 0 }
  0x13   : > { %s1306_s28 = smov (%p32_p0, %s31_s28), 0  ;;  %s1308_s29 = smov (!%p32_p0, %s34_s29), %s912_s24 }
  0x14   : > { %1263 = sst [smem:[#allocation15_spill]] %s1306_s28  ;;  %s39_s4 = ssub.s32 %s908_s23, %s1306_s28 }
  0x15   : > { %p1029_p3 = por %p51_p2, %p50_p1  ;;  %p36_p4 = scmp.ge.s32.totalorder %s1308_s29, 2 }
  0x16   : > { %p56_p5 = scmp.ne.s32.totalorder %s892_s19, %s888_s18  ;;  %p1036_p6 = scmp.eq.s32.totalorder %s1251_s26, 0 }
  0x17   : > { %p67_p7 = scmp.eq.s32.totalorder %s39_s4, 0  ;;  %s1310_s29 = smov (%p36_p4, %s1308_s29), 0 }
  0x18   : > { %1266 = sst [smem:[#allocation16_spill]] %s1310_s29  ;;  %p1044_p8 = por %p1036_p6, %p56_p5 }
  0x19   : > { %s69_s8 = sadd.s32 1, %s884_s17  ;;  %s38_s9 = ssub.s32 %s912_s24, %s1310_s29 }
  0x1a   : > { %p76_p9 = scmp.ne.s32.totalorder %s884_s17, %s880_s16  ;;  %s40_s10 = sor.u32 %s39_s4, %s38_s9 }
  0x1b   : > { %p82_p10 = scmp.ne.s32.totalorder %s880_s16, %s876_s15  ;;  %p41_p11 = scmp.eq.s32.totalorder %s40_s10, 0 }
  0x1c   : > { %p1057_p12 = por %p76_p9, %p51_p2  ;;  %p114_p0 = scmp.eq.s32.totalorder %s38_s9, 0 }
  0x1d   : > { %s1062_s18 = scalar_select %p67_p7, %s884_s17, %s69_s8  }
  0x1e   : > { %s1065_s27 = scalar_select %p41_p11, %s896_s20, %s43_s30  }
  0x1f   : > { %1269 = sst [smem:[#allocation17_spill]] %s1062_s18  ;;  %p1069_p13 = por %p82_p10, %p1036_p6 }
  0x20   : > { %1270 = sst [smem:[#allocation18_spill]] %s1065_s27  ;;  %s116_s15 = sadd.s32 1, %s872_s14 }
  0x21   : > { %s1271_s26 = scalar_select %p1069_p13, 1, 0 }
  0x22   : > { %p126_p1 = scmp.ne.s32.totalorder %s872_s14, %s868_s13  ;;  %s1273_s10 = sadd.s32 4294967295, %s916_s25  }
  0x23   : > { %s1077_s4 = scalar_select %p114_p0, %s872_s14, %s116_s15  }
  0x24   : > { %p127_p2 = scmp.eq.s32.totalorder %s1273_s10, 3  ;;  %p132_p4 = scmp.ne.s32.totalorder %s868_s13, %s864_s12 }
  0x25   : > { %1272 = sst [smem:[#allocation19_spill]] %s1077_s4  ;;  %s1274_s8 = sadd.s32 4294967294, %s916_s25  }
  0x26   : > { %p133_p5 = scmp.eq.s32.totalorder %s1274_s8, 3  ;;  %p1085_p7 = por %p127_p2, %p126_p1 }
  0x27   : > { %p581_p6 = scmp.lt.s32.totalorder %s916_s25, 4  ;;  %s156_s9 = sand.u32 1, %s896_s20  }
  0x28   : > { %s1275_s30 = scalar_select %p1085_p7, 1, 0 }
  0x29   : > { %p1090_p9 = por %p133_p5, %p132_p4  ;;  %s509_s15 = sshll.u32 %s156_s9, 2 }
  0x2a   : > { %s510_s29 = sshll.u32 %s912_s24, 1  ;;  %s160_s10 = scalar_lea.vmem [#allocation3], %s509_s15 }
  0x2b   : > { %s1276_s6 = scalar_select %p1090_p9, 1, 0 }
  0x2c   : > { %s165_s28 = sadd.s32 %s908_s23, %s510_s29  ;;  %s169_s27 = sshll.u32 %s160_s10, 4  ;;  %s170_s27 = int_to_ptr.vmem [resolvable:$true] %s169_s27 }
  0x2d   : > { %s511_s18 = sshll.u32 %s165_s28, 6  ;;  %s1277_s0 = sld [smem:[#allocation20_spill]] }
  0x2e   : > { %p1102_p10 = pnand %p581_p6, %p1029_p3  ;;  %p1108_p11 = pnand %p581_p6, %p1057_p12 }
  0x2f   : > { %p515_p0 = scmp.ge.s32.totalorder %s916_s25, 1  ;;  %p195_p1 = scmp.lt.s32.totalorder %s916_s25, 5 }
  0x30   : > { %s157_s29 = scalar_lea.sflag [#allocation4], %s156_s9  ;;  %p714_p2 = pneg %p1102_p10 }
  0x31   : > { %s725_s28 = scalar_lea.vmem %s170_s27, 64  ;;  %s918_s5 = smov [#allocation3]  }
  0x32   : > { %p726_p4 = scmp.ne.s32.totalorder %s170_s27, %s725_s28 }
  0x33   : > { %s167_s14 = scalar_lea.hbm %s1277_s0, %s511_s18  ;;  %s730_s18 = sshll.u32 %s918_s5, 4  ;;  %s731_s18 = int_to_ptr.vmem [resolvable:$false] %s730_s18 }
  0x34   : > { %p728_p5 = pnand %p726_p4, %p714_p2  ;;  %s732_s4 = scalar_lea.vmem %s731_s18, 128 }
  0x35   : > { %p733_p3 = scmp.lt.s32.totalorder %s170_s27, %s731_s18  ;;  %p734_p7 = scmp.lt.s32.totalorder %s732_s4, %s725_s28 }
  0x36   : > { %p729_p9 = pneg %p728_p5 }
  0x37   : > { %p735_p13 = por %p734_p7, %p733_p3 }
  0x39   : > { %p736_p12 = pnand %p735_p13, %p729_p9 }
  0x3b   : > { %739 = shalt.err (!%p736_p12)
}
  0x3c   : > { %573 = dma.hbm_to_vmem [thread:$0]  (!%p1102_p10), %s167_s14, 64, %s170_s27, %s157_s29  }
  0x3d   : > { %p1122_p6 = pnand %p515_p0, %p195_p1  ;;  %s176_s9 = sand.u32 1, %s884_s17  }
  0x3e   : > { %s534_s15 = sshll.u32 %s908_s23, 10  ;;  %s512_s10 = sshll.u32 %s176_s9, 6 }
  0x3f   : > { %s186_s5 = scalar_lea.hbm %s1248_s1, %s534_s15  ;;  %s180_s12 = scalar_lea.vmem [#allocation6], %s512_s10 }
  0x40   : > { %s187_s18 = sshll.u32 %s180_s12, 4  ;;  %s177_s4 = scalar_lea.sflag [#allocation7], %s176_s9  ;;  %s188_s18 = int_to_ptr.vmem [resolvable:$true] %s187_s18 }
  0x41   : > { %p742_p13 = pneg %p1108_p11  ;;  %s753_s14 = scalar_lea.vmem %s188_s18, 1024 }
  0x42   : > { %p754_p7 = scmp.ne.s32.totalorder %s188_s18, %s753_s14  ;;  %s919_s27 = smov [#allocation6]  }
  0x43   : > { %s758_s29 = sshll.u32 %s919_s27, 4  ;;  %s759_s29 = int_to_ptr.vmem [resolvable:$false] %s758_s29 }
  0x44   : > { %p756_p9 = pnand %p754_p7, %p742_p13  ;;  %s760_s0 = scalar_lea.vmem %s759_s29, 2048 }
  0x45   : > { %p761_p0 = scmp.lt.s32.totalorder %s188_s18, %s759_s29  ;;  %p762_p1 = scmp.lt.s32.totalorder %s760_s0, %s753_s14 }
  0x46   : > { %p757_p10 = pneg %p756_p9 }
  0x47   : > { %p763_p2 = por %p762_p1, %p761_p0 }
  0x49   : > { %p764_p4 = pnand %p763_p2, %p757_p10 }
  0x4b   : > { %767 = shalt.err (!%p764_p4)
}
  0x4c   : > { %s920_s15 = smov 64   ;;  %s921_s10 = smov 4  }
  0x4d   : > { %576 = dma.hbm_to_vmem [thread:$0]  (!%p1108_p11), %s186_s5, 1024, %s188_s18, %s177_s4, %s920_s15, %s920_s15, %s921_s10  }
  0x4e   : > { %199 = sbr.rel (%p1122_p6) target bundleno = 673 (0x2a1), region = 32  ;;  %s201_s9 = sand.u32 (!%p1122_p6), 1, %s892_s19  }
  0x4f   : > { %s1138_s8 = sshll.u32 (!%p1122_p6), %s201_s9, 2  ;;  %s202_s28 = scalar_lea.sflag (!%p1122_p6), [#allocation4], %s201_s9 }
  0x50   : > { %s205_s12 = scalar_lea.vmem (!%p1122_p6), [#allocation3], %s1138_s8 }
  0x53   : > { %851 = dma.done.wait (%p1044_p8), %s202_s28, 64  }
  0x54   : > { %853 = vsyncadd (%p1044_p8), %s202_s28, 4294967232  ;;  %s210_s0 = sand.u32 1, %s880_s16   ;;  %p1281_p11 = scmp.ne.s32.totalorder %s1271_s26, 0 }
  0x55   : > { %s517_s20 = sshll.u32 %s210_s0, 6  ;;  %s211_s5 = scalar_lea.sflag [#allocation7], %s210_s0 }
  0x56   : > { %s1146_s11 = scalar_lea.vmem [#allocation6], %s517_s20 }
  0x57   : > { %855 = dma.done.wait (%p1281_p11), %s211_s5, 1024  }
  0x58   : > { %857 = vsyncadd (%p1281_p11), %s211_s5, 4294966272  ;;  %s239_s18 = sand.u32 1, %s868_s13   ;;  %p519_p8 = scmp.ne.s32.totalorder %s900_s21, 0 }
  0x59   : > { %s1155_s4 = sshll.u32 %s239_s18, 3 }
  0x5a   : > { %s241_s7 = scalar_lea.vmem [#allocation8], %s1155_s4  ;;  %247 = sbr.rel (%p519_p8) target bundleno = 97 (0x61), region = 44 }
  0x5f   : > { %v922_v0 = vmov 0.0  }
  0x60   : > { %248 = vst [vmem:[#allocation2] sm:$0xff] %v922_v0 }
  0x61 PF: > { %v700_v1 = vld [vmem:[%s1146_s11 + $0x38] sm:$0xff]   ;;  %v923_v2 = vmov 0.0   ;;  %v701_v3 = vld [vmem:[%s1146_s11 + $0x30] sm:$0xff]   ;;  %vm924_vm0 = vmmov 0   ;;  %v702_v4 = vld [vmem:[%s1146_s11 + $0x28] sm:$0xff]   ;;  %p528_p5 = scmp.ne.s32.totalorder %s900_s21, 1 }
  0x62   : > { %544 = vmatprep.subr.bf16.mxu0 %v923_v2  ;;  %560 = vmatprep.mubr.msk.bf16.mxu0 %vm924_vm0, %v923_v2  ;;  %v703_v5 = vld [vmem:[%s1146_s11 + $0x20] sm:$0xff]   ;;  %v704_v6 = vld [vmem:[%s1146_s11 + $0x18] sm:$0xff]   ;;  %v705_v7 = vld [vmem:[%s1146_s11 + $0x10] sm:$0xff]  }
  0x63   : > { %545 = vmatpush3.bf16.msra.mxu0 %v700_v1  ;;  %v706_v8 = vld [vmem:[%s1146_s11 + $0x8] sm:$0xff]   ;;  %v707_v9 = vld [vmem:[%s1146_s11] sm:$0xff]   ;;  %v250_v10 = vld [vmem:[%s205_s12] sm:$0xf] }
  0x64   : > { %546 = vmatprep.subr.bf16.mxu0 %v923_v2 }
  0x67   : > { %547 = vmatpush3.bf16.msra.mxu0 %v701_v3  ;;  %v249_v11 = vld [vmem:[#allocation2] sm:$0xff] }
  0x68   : > { %548 = vmatprep.subr.bf16.mxu0 %v923_v2 }
  0x6b   : > { %549 = vmatpush3.bf16.msra.mxu0 %v702_v4 }
  0x6c   : > { %550 = vmatprep.subr.bf16.mxu0 %v923_v2 }
  0x6f   : > { %551 = vmatpush3.bf16.msra.mxu0 %v703_v5 }
  0x70   : > { %552 = vmatprep.subr.bf16.mxu0 %v923_v2 }
  0x73   : > { %553 = vmatpush3.bf16.msra.mxu0 %v704_v6 }
  0x74   : > { %554 = vmatprep.subr.bf16.mxu0 %v923_v2 }
  0x77   : > { %555 = vmatpush3.bf16.msra.mxu0 %v705_v7 }
  0x78   : > { %556 = vmatprep.subr.bf16.mxu0 %v923_v2 }
  0x7b   : > { %557 = vmatpush3.bf16.msra.mxu0 %v706_v8 }
  0x7c   : > { %558 = vmatprep.subr.bf16.mxu0 %v923_v2 }
  0x7f   : > { %559 = vmatpush3.bf16.msra.mxu0 %v707_v9 }
  0x82   : > { %561 = vmatmul.mubr.bf16.vlgmr.msra.gmra.mxu0 %v250_v10 }
 0x142   : > { %v349_v12 = vpop.f32.mrf.mxu0 }
 0x143   : > { %v355_v13 = vadd.f32 %v349_v12, %v249_v11 }
 0x144   : > { %v562_v14 = vpop.f32.mrf.mxu0  ;;  %360 = sbr.rel (%p528_p5) target bundleno = 649 (0x289), region = 48 }
 0x145   : > { %356 = vst [vmem:[#allocation2] sm:$0xff] %v355_v13 }
 0x146   : > { %v352_v15 = vpop.f32.mrf.mxu0 }
 0x148   : > { %v563_v16 = vpop.f32.mrf.mxu0 }
 0x149   : > { %v529_v18 = vld [vmem:[%s1249_s2] ss:$0 sm:$0xff]  ;;  %v370_v19 = vlaneseq }
 0x14b   : > { %v371_v21 = vand.u32 127, %v370_v19 }
 0x14c   : > { %v361_v17 = vld [vmem:[#allocation2] sm:$0xff] }
 0x14d   : > { %v369_v20 = vadd.f32 %v529_v18, %v361_v17  ;;  %vm372_vm1 = vcmp.lt.s32.totalorder %v371_v21, 16 }
 0x14f   : > { %v373_v22 = vsel %vm372_vm1, %v369_v20, -1e+30 }
 0x150   : > { %374 = vmax.xlane.f32.xlu0 %v373_v22 }
 0x1d9   : > { %v375_v23 = vpop.xlane.xlu0 %374 }
 0x1da   : > { %v376_v24 = vsub.f32 %v373_v22, %v375_v23 }
 0x1dc   : > { %v377_v25 = vmul.f32 1.442695, %v376_v24 }
 0x1de   : > { %708 = vpow2.f32 %v377_v25 }
 0x1eb   : > { %v709_v26 = vpop.eup %708 }
 0x1ec   : > { %379 = vadd.xlane.f32.xlu0 %v709_v26 }
 0x275   : > { %v380_v27 = vpop.xlane.xlu0 %379 }
 0x276   : > { %710 = vlog2.f32 %v380_v27 }
 0x283   : > { %v711_v28 = vpop.eup %710 }
 0x284   : > { %v382_v29 = vmul.f32 0.6931472, %v711_v28 }
 0x286   : > { %v383_v30 = vsub.f32 %v376_v24, %v382_v29 }
 0x288   : > { %384 = vst [vmem:[%s241_s7] sm:$0xff] %v383_v30 }
 0x289 PF: > { %s531_s21 = sshll.u32 %s904_s22, 7  ;;  %s399_s10 = sshll.u32 %s241_s7, 4  ;;  %s400_s10 = int_to_ptr.vmem [resolvable:$true] %s399_s10 }
 0x28a   : > { %s397_s15 = scalar_lea.hbm %s1250_s3, %s531_s21  ;;  %s386_s9 = scalar_lea.sflag [#allocation5], %s239_s18 }
 0x28b   : > { %s768_s8 = scalar_lea.vmem %s400_s10, 128  ;;  %p1282_p12 = scmp.ne.s32.totalorder %s1275_s30, 0 }
 0x28c   : > { %p769_p3 = scmp.ne.s32.totalorder %s400_s10, %s768_s8  ;;  %s925_s28 = smov [#allocation8]  }
 0x28d   : > { %s772_s12 = sshll.u32 %s925_s28, 4  ;;  %s773_s12 = int_to_ptr.vmem [resolvable:$false] %s772_s12 }
 0x28e   : > { %p770_p6 = pnand %p769_p3, %p1282_p12  ;;  %s774_s0 = scalar_lea.vmem %s773_s12, 256 }
 0x28f   : > { %p775_p7 = scmp.lt.s32.totalorder %s400_s10, %s773_s12  ;;  %p776_p9 = scmp.lt.s32.totalorder %s774_s0, %s768_s8 }
 0x290   : > { %p771_p13 = pneg %p770_p6 }
 0x291   : > { %p777_p10 = por %p776_p9, %p775_p7 }
 0x293   : > { %p778_p0 = pnand %p777_p10, %p771_p13 }
 0x295   : > { %781 = shalt.err (!%p778_p0)
}
 0x296   : > { %s782_s22 = scalar_lea.hbm %s397_s15, 128  ;;  %s786_s11 = scalar_lea.hbm %s1250_s3, 256 }
 0x297   : > { %p783_p1 = scmp.ne.s32.totalorder %s397_s15, %s782_s22  ;;  %p787_p11 = scmp.lt.s32.totalorder %s397_s15, %s1250_s3 }
 0x298   : > { %p788_p8 = scmp.lt.s32.totalorder %s786_s11, %s782_s22 }
 0x299   : > { %p784_p2 = pnand %p783_p1, %p1282_p12 }
 0x29a   : > { %p789_p5 = por %p788_p8, %p787_p11 }
 0x29b   : > { %p785_p4 = pneg %p784_p2 }
 0x29d   : > { %p790_p3 = pnand %p789_p5, %p785_p4 }
 0x29f   : > { %793 = shalt.err (!%p790_p3)
}
 0x2a0   : > { %568 = dma.vmem_to_hbm [thread:$0]  (%p1282_p12), %s400_s10, 128, %s397_s15, %s386_s9  }
 0x2a1 PF: > { %s1283_s7 = sld [smem:[#allocation12_spill]]  ;;  %p582_p6 = scmp.ge.s32.totalorder %s916_s25, 2 }
 0x2a2   : > { %p1284_p13 = scmp.ne.s32.totalorder %s1276_s6, 0 }
 0x2a4   : > { %p578_p7 = pnand %p582_p6, %p1284_p13 }
 0x2a6   : > { %p579_p9 = pneg %p578_p7 }
 0x2a7   : > { %s411_s26 = sand.u32 1, %s1283_s7  }
 0x2a8   : > { %s412_s14 = scalar_lea.sflag [#allocation5], %s411_s26 }
 0x2a9   : > { %859 = dma.done.wait (%p579_p9), %s412_s14, 128  }
 0x2aa   : > { %861 = vsyncadd (%p579_p9), %s412_s14, 4294967168  ;;  %s22_s25 = sadd.s32 1, %s916_s25   ;;  %s1286_s30 = sld [smem:[#allocation13_spill]] }
 0x2ab   : > { %p1200_p10 = scmp.ge.s32.totalorder %s22_s25, 6   ;;  %s1287_s14 = sld [smem:[#allocation19_spill]] }
 0x2ac   : > { %s1288_s27 = sld [smem:[#allocation17_spill]]  ;;  %s1294_s12 = smov %s868_s13 }
 0x2ad   : > { %s1289_s29 = sld [smem:[#allocation14_spill]]  ;;  %s1296_s15 = smov %s880_s16 }
 0x2ae   : > { %s1290_s20 = sld [smem:[#allocation18_spill]]  ;;  %s1297_s16 = smov %s884_s17 }
 0x2af   : > { %s1291_s6 = sld [smem:[#allocation15_spill]]  ;;  %s1299_s18 = smov %s892_s19 }
 0x2b0   : > { %s1292_s10 = sld [smem:[#allocation16_spill]]  ;;  %s1295_s13 = smov %s1286_s30 }
 0x2b1   : > { %s1301_s21 = smov %s908_s23  ;;  %s1302_s22 = smov %s912_s24 }
 0x2b2   : > { %s1298_s17 = smov %s1288_s27  ;;  %21 = sbr.rel (!%p1200_p10) target bundleno = 14 (0xe), region = 98 }
 0x2b3   : > { %s1300_s19 = smov %s1289_s29 }
 0x2b5   : > { %s1303_s23 = smov %s1291_s6 }
 0x2b6   : > { %s1304_s24 = smov %s1292_s10 }
 0x2b7   :  { %417 = vsyncpa [#allocation4], 1 }
 0x2b8   :  { %419 = vsyncpa [#allocation4 + $0x1], 1 }
 0x2b9   :  { %420 = vsyncpa [#allocation7], 1 }
 0x2ba   :  { %422 = vsyncpa [#allocation7 + $0x1], 1 }
 0x2bb   :  { %423 = vsyncpa [#allocation5], 1 }
 0x2bc   :  { %425 = vsyncpa [#allocation5 + $0x1], 1 }

</bundles_post_ra>
